<compile_context>
chip_gen: v7x
topology: tpu7x:2x2x1
jax: 0.10.0
libtpu: 0.0.40
codegen_flags: <defaults>
</compile_context>

<pallas_src>
import functools

import jax
import jax.numpy as jnp
from jax.experimental import pallas as pl
from jax.experimental.pallas import tpu as pltpu


def custom_rnn_kernel(x_ref, wih_ref, whh_ref, brnn_ref, wfc_ref, bfc_ref,
                      out_ref, *, seq_len, batch, pad_batch):
    """Fused forward: relayout + input projection + tanh recurrence + FC.

      x_ref:    (B, T, D)   batch-first input (as given by the module)
      wih_ref:  (D, H)      W_ih^T
      whh_ref:  (H, H)      W_hh^T
      brnn_ref: (1, H)      b_ih + b_hh
      wfc_ref:  (H, O)      W_fc^T
      bfc_ref:  (1, O)      b_fc
      out_ref:  (B, T, O)   batch-first logits
    """
    T, B, BP = seq_len, batch, pad_batch
    D = x_ref.shape[2]
    H = whh_ref.shape[0]
    O = wfc_ref.shape[1]

    # ---- One-time in-kernel relayout: batch-first -> time-major, pad the
    # batch rows up to a full 8-sublane tile so every per-step slice below is
    # (8, *)-tile aligned (padded rows are zero inputs, independent, dropped
    # before writeback). ----
    x_tbd = jnp.swapaxes(x_ref[...], 0, 1)                      # (T, B, D)
    if BP > B:
        x_tbd = jnp.concatenate(
            [x_tbd, jnp.zeros((T, BP - B, D), jnp.float32)], axis=1)
    x_tm = x_tbd.reshape(T * BP, D)                             # (T*BP, D)

    # ---- Hoisted input projection: ONE matmul + ONE bias add for all
    # timesteps, off the serial chain. ----
    xw = (jnp.dot(x_tm, wih_ref[...], preferred_element_type=jnp.float32)
          + brnn_ref[...])                                      # (T*BP, H)

    whh = whh_ref[...]                                          # loaded once
    h = jnp.zeros((BP, H), jnp.float32)

    # ---- Sequential recurrence: statically unrolled, h carried in vregs,
    # every slice a full sublane-tile block at a static offset. No VMEM
    # scratch, no store->load dependency. ----
    hs = []
    for t in range(T):
        lo = t * BP
        h = jnp.tanh(xw[lo:lo + BP, :]
                     + jnp.dot(h, whh, preferred_element_type=jnp.float32))
        hs.append(h)

    hs_all = jnp.concatenate(hs, axis=0)                        # (T*BP, H)

    # ---- Hoisted FC epilogue: ONE matmul + bias over all timesteps. ----
    logits = (jnp.dot(hs_all, wfc_ref[...],
                      preferred_element_type=jnp.float32)
              + bfc_ref[...])                                   # (T*BP, O)

    # Drop padded rows, back to batch-first, single writeback.
    # TODO(synk): O=8 < 128 lanes -> masked vst on the final store; negligible
    # at this size (lane-dense packing noted as low priority in review).
    logits = logits.reshape(T, BP, O)[:, :B, :]                 # (T, B, O)
    out_ref[...] = jnp.swapaxes(logits, 0, 1).astype(out_ref.dtype)


def prepare_params(w_ih, w_hh, b_ih, b_hh, w_fc, b_fc):
    """One-time weight prep (hoisted out of the per-call forward)."""
    H = w_ih.shape[0]
    O = w_fc.shape[0]
    wih_t = jnp.asarray(w_ih, jnp.float32).T                    # (D, H)
    whh_t = jnp.asarray(w_hh, jnp.float32).T                    # (H, H)
    b_rnn = (jnp.asarray(b_ih, jnp.float32)
             + jnp.asarray(b_hh, jnp.float32)).reshape(1, H)    # (1, H)
    wfc_t = jnp.asarray(w_fc, jnp.float32).T                    # (H, O)
    b_out = jnp.asarray(b_fc, jnp.float32).reshape(1, O)        # (1, O)
    return wih_t, whh_t, b_rnn, wfc_t, b_out


@jax.jit
def custom_rnn_forward(x, params):
    """Pallas implementation of CustomRNN.forward.

    x: (B, T, D) batch-first; params from prepare_params().
    returns logits (B, T, O) float32.
    """
    wih_t, whh_t, b_rnn, wfc_t, b_out = params
    B, T, D = x.shape
    H = wih_t.shape[1]
    O = wfc_t.shape[1]
    BP = max(8, -(-B // 8) * 8)   # batch rows padded to a full sublane tile

    kernel = functools.partial(custom_rnn_kernel,
                               seq_len=T, batch=B, pad_batch=BP)

    # TODO(synk): if B grows, add a leading batch grid axis marked "parallel"
    # (recurrence is independent per batch row) to use both v7x TensorCores.
    return pl.pallas_call(
        kernel,
        out_shape=jax.ShapeDtypeStruct((B, T, O), jnp.float32),
        grid=(1,),
        in_specs=[
            pl.BlockSpec((B, T, D), lambda i: (0, 0, 0)),
            pl.BlockSpec((D, H), lambda i: (0, 0)),
            pl.BlockSpec((H, H), lambda i: (0, 0)),
            pl.BlockSpec((1, H), lambda i: (0, 0)),
            pl.BlockSpec((H, O), lambda i: (0, 0)),
            pl.BlockSpec((1, O), lambda i: (0, 0)),
        ],
        out_specs=pl.BlockSpec((B, T, O), lambda i: (0, 0, 0)),
        compiler_params=pltpu.CompilerParams(
            dimension_semantics=("arbitrary",)),   # recurrence is sequential
    )(jnp.asarray(x, jnp.float32), wih_t, whh_t, b_rnn, wfc_t, b_out)


def reference_forward(x, w_ih, w_hh, b_ih, b_hh, w_fc, b_fc):
    """Pure-JAX reference matching PyTorch nn.RNN + nn.Linear semantics."""
    B, T, D = x.shape
    H = w_ih.shape[0]

    def step(h, x_t):
        h_new = jnp.tanh(x_t @ w_ih.T + b_ih + h @ w_hh.T + b_hh)
        return h_new, h_new

    h0 = jnp.zeros((B, H), jnp.float32)
    _, hs = jax.lax.scan(step, h0, jnp.swapaxes(x, 0, 1))   # (T, B, H)
    out = jnp.swapaxes(hs, 0, 1)                            # (B, T, H)
    return out @ w_fc.T + b_fc


if __name__ == "__main__":
    # Small shapes consistent with the module: batch=2, seq=8, input_dim=16,
    # hidden_dim=32, output_dim=8.
    B, T, D, H, O = 2, 8, 16, 32, 8

    key = jax.random.PRNGKey(0)
    kx, k1, k2, k3, k4, k5, k6 = jax.random.split(key, 7)

    bound = 1.0 / jnp.sqrt(H)  # PyTorch default uniform init bound
    x = jax.random.normal(kx, (B, T, D), jnp.float32)
    w_ih = jax.random.uniform(k1, (H, D), jnp.float32, -bound, bound)
    w_hh = jax.random.uniform(k2, (H, H), jnp.float32, -bound, bound)
    b_ih = jax.random.uniform(k3, (H,), jnp.float32, -bound, bound)
    b_hh = jax.random.uniform(k4, (H,), jnp.float32, -bound, bound)
    w_fc = jax.random.uniform(k5, (O, H), jnp.float32, -bound, bound)
    b_fc = jax.random.uniform(k6, (O,), jnp.float32, -bound, bound)

    params = prepare_params(w_ih, w_hh, b_ih, b_hh, w_fc, b_fc)
    logits = custom_rnn_forward(x, params)
    jax.block_until_ready(logits)

    ref = reference_forward(x, w_ih, w_hh, b_ih, b_hh, w_fc, b_fc)
    assert logits.shape == (B, T, O)
    assert jnp.allclose(logits, ref, atol=1e-5, rtol=1e-5)

    print("KERNEL_OK")
</pallas_src>

<mosaic_0001>
module attributes {stable_mosaic.version = 11 : i64} {
  func.func @custom_rnn_kernel(%arg0: i32, %arg1: memref<2x8x16xf32, #tpu.memory_space<vmem>>, %arg2: memref<16x32xf32, #tpu.memory_space<vmem>>, %arg3: memref<32x32xf32, #tpu.memory_space<vmem>>, %arg4: memref<1x32xf32, #tpu.memory_space<vmem>>, %arg5: memref<32x8xf32, #tpu.memory_space<vmem>>, %arg6: memref<1x8xf32, #tpu.memory_space<vmem>>, %arg7: memref<2x8x8xf32, #tpu.memory_space<vmem>>) attributes {dimension_semantics = [#tpu.dimension_semantics<arbitrary>], iteration_bounds = array<i64: 1>, scalar_prefetch = 0 : i64, scratch_operands = 0 : i64, tpu.core_type = #tpu.core_type<tc>, window_params = [{pipeline_mode = #tpu.pipeline_mode<synchronous>, transform_indices = @transform_0, window_bounds = array<i64: 2, 8, 16>}, {pipeline_mode = #tpu.pipeline_mode<synchronous>, transform_indices = @transform_1, window_bounds = array<i64: 16, 32>}, {pipeline_mode = #tpu.pipeline_mode<synchronous>, transform_indices = @transform_2, window_bounds = array<i64: 32, 32>}, {pipeline_mode = #tpu.pipeline_mode<synchronous>, transform_indices = @transform_3, window_bounds = array<i64: 1, 32>}, {pipeline_mode = #tpu.pipeline_mode<synchronous>, transform_indices = @transform_4, window_bounds = array<i64: 32, 8>}, {pipeline_mode = #tpu.pipeline_mode<synchronous>, transform_indices = @transform_5, window_bounds = array<i64: 1, 8>}, {pipeline_mode = #tpu.pipeline_mode<synchronous>, transform_indices = @transform_6, window_bounds = array<i64: 2, 8, 8>}]} {
    %c0 = arith.constant 0 : index
    %c0_0 = arith.constant 0 : index
    %c0_1 = arith.constant 0 : index
    %0 = vector.load %arg1[%c0, %c0_0, %c0_1] : memref<2x8x16xf32, #tpu.memory_space<vmem>>, vector<2x8x16xf32>
    %1 = tpu.transpose %0, [1, 0, 2] : vector<2x8x16xf32> -> vector<8x2x16xf32>
    %cst = arith.constant 0.000000e+00 : f32
    %2 = vector.broadcast %cst : f32 to vector<8x6x16xf32>
    %3 = tpu.concatenate %1, %2 in 1 : vector<8x2x16xf32>, vector<8x6x16xf32> -> vector<8x8x16xf32>
    %4 = vector.shape_cast %3 : vector<8x8x16xf32> to vector<64x16xf32>
    %c0_2 = arith.constant 0 : index
    %c0_3 = arith.constant 0 : index
    %5 = vector.load %arg2[%c0_2, %c0_3] : memref<16x32xf32, #tpu.memory_space<vmem>>, vector<16x32xf32>
    %cst_4 = arith.constant dense<0.000000e+00> : vector<64x32xf32>
    %6 = tpu.matmul %4, %5, %cst_4 {dimension_numbers = #tpu.dot_dimension_numbers<[1], [0], [0], [1], [0, 0, 1, 1], [], []>} : vector<64x16xf32>, vector<16x32xf32>, vector<64x32xf32> -> vector<64x32xf32>
    %c0_5 = arith.constant 0 : index
    %c0_6 = arith.constant 0 : index
    %7 = vector.load %arg4[%c0_5, %c0_6] : memref<1x32xf32, #tpu.memory_space<vmem>>, vector<1x32xf32>
    %8 = vector.broadcast %7 : vector<1x32xf32> to vector<64x32xf32>
    %9 = arith.addf %6, %8 : vector<64x32xf32>
    %c0_7 = arith.constant 0 : index
    %c0_8 = arith.constant 0 : index
    %10 = vector.load %arg3[%c0_7, %c0_8] : memref<32x32xf32, #tpu.memory_space<vmem>>, vector<32x32xf32>
    %cst_9 = arith.constant 0.000000e+00 : f32
    %11 = vector.broadcast %cst_9 : f32 to vector<8x32xf32>
    %12 = vector.extract_strided_slice %9 {offsets = [0, 0], sizes = [8, 32], strides = [1, 1]} : vector<64x32xf32> to vector<8x32xf32>
    %cst_10 = arith.constant dense<0.000000e+00> : vector<8x32xf32>
    %13 = tpu.matmul %11, %10, %cst_10 {dimension_numbers = #tpu.dot_dimension_numbers<[1], [0], [0], [1], [0, 0, 1, 1], [], []>} : vector<8x32xf32>, vector<32x32xf32>, vector<8x32xf32> -> vector<8x32xf32>
    %14 = arith.addf %12, %13 : vector<8x32xf32>
    %15 = math.tanh %14 : vector<8x32xf32>
    %16 = vector.extract_strided_slice %9 {offsets = [8, 0], sizes = [8, 32], strides = [1, 1]} : vector<64x32xf32> to vector<8x32xf32>
    %cst_11 = arith.constant dense<0.000000e+00> : vector<8x32xf32>
    %17 = tpu.matmul %15, %10, %cst_11 {dimension_numbers = #tpu.dot_dimension_numbers<[1], [0], [0], [1], [0, 0, 1, 1], [], []>} : vector<8x32xf32>, vector<32x32xf32>, vector<8x32xf32> -> vector<8x32xf32>
    %18 = arith.addf %16, %17 : vector<8x32xf32>
    %19 = math.tanh %18 : vector<8x32xf32>
    %20 = vector.extract_strided_slice %9 {offsets = [16, 0], sizes = [8, 32], strides = [1, 1]} : vector<64x32xf32> to vector<8x32xf32>
    %cst_12 = arith.constant dense<0.000000e+00> : vector<8x32xf32>
    %21 = tpu.matmul %19, %10, %cst_12 {dimension_numbers = #tpu.dot_dimension_numbers<[1], [0], [0], [1], [0, 0, 1, 1], [], []>} : vector<8x32xf32>, vector<32x32xf32>, vector<8x32xf32> -> vector<8x32xf32>
    %22 = arith.addf %20, %21 : vector<8x32xf32>
    %23 = math.tanh %22 : vector<8x32xf32>
    %24 = vector.extract_strided_slice %9 {offsets = [24, 0], sizes = [8, 32], strides = [1, 1]} : vector<64x32xf32> to vector<8x32xf32>
    %cst_13 = arith.constant dense<0.000000e+00> : vector<8x32xf32>
    %25 = tpu.matmul %23, %10, %cst_13 {dimension_numbers = #tpu.dot_dimension_numbers<[1], [0], [0], [1], [0, 0, 1, 1], [], []>} : vector<8x32xf32>, vector<32x32xf32>, vector<8x32xf32> -> vector<8x32xf32>
    %26 = arith.addf %24, %25 : vector<8x32xf32>
    %27 = math.tanh %26 : vector<8x32xf32>
    %28 = vector.extract_strided_slice %9 {offsets = [32, 0], sizes = [8, 32], strides = [1, 1]} : vector<64x32xf32> to vector<8x32xf32>
    %cst_14 = arith.constant dense<0.000000e+00> : vector<8x32xf32>
    %29 = tpu.matmul %27, %10, %cst_14 {dimension_numbers = #tpu.dot_dimension_numbers<[1], [0], [0], [1], [0, 0, 1, 1], [], []>} : vector<8x32xf32>, vector<32x32xf32>, vector<8x32xf32> -> vector<8x32xf32>
    %30 = arith.addf %28, %29 : vector<8x32xf32>
    %31 = math.tanh %30 : vector<8x32xf32>
    %32 = vector.extract_strided_slice %9 {offsets = [40, 0], sizes = [8, 32], strides = [1, 1]} : vector<64x32xf32> to vector<8x32xf32>
    %cst_15 = arith.constant dense<0.000000e+00> : vector<8x32xf32>
    %33 = tpu.matmul %31, %10, %cst_15 {dimension_numbers = #tpu.dot_dimension_numbers<[1], [0], [0], [1], [0, 0, 1, 1], [], []>} : vector<8x32xf32>, vector<32x32xf32>, vector<8x32xf32> -> vector<8x32xf32>
    %34 = arith.addf %32, %33 : vector<8x32xf32>
    %35 = math.tanh %34 : vector<8x32xf32>
    %36 = vector.extract_strided_slice %9 {offsets = [48, 0], sizes = [8, 32], strides = [1, 1]} : vector<64x32xf32> to vector<8x32xf32>
    %cst_16 = arith.constant dense<0.000000e+00> : vector<8x32xf32>
    %37 = tpu.matmul %35, %10, %cst_16 {dimension_numbers = #tpu.dot_dimension_numbers<[1], [0], [0], [1], [0, 0, 1, 1], [], []>} : vector<8x32xf32>, vector<32x32xf32>, vector<8x32xf32> -> vector<8x32xf32>
    %38 = arith.addf %36, %37 : vector<8x32xf32>
    %39 = math.tanh %38 : vector<8x32xf32>
    %40 = vector.extract_strided_slice %9 {offsets = [56, 0], sizes = [8, 32], strides = [1, 1]} : vector<64x32xf32> to vector<8x32xf32>
    %cst_17 = arith.constant dense<0.000000e+00> : vector<8x32xf32>
    %41 = tpu.matmul %39, %10, %cst_17 {dimension_numbers = #tpu.dot_dimension_numbers<[1], [0], [0], [1], [0, 0, 1, 1], [], []>} : vector<8x32xf32>, vector<32x32xf32>, vector<8x32xf32> -> vector<8x32xf32>
    %42 = arith.addf %40, %41 : vector<8x32xf32>
    %43 = math.tanh %42 : vector<8x32xf32>
    %44 = tpu.concatenate %15, %19, %23, %27, %31, %35, %39, %43 in 0 : vector<8x32xf32>, vector<8x32xf32>, vector<8x32xf32>, vector<8x32xf32>, vector<8x32xf32>, vector<8x32xf32>, vector<8x32xf32>, vector<8x32xf32> -> vector<64x32xf32>
    %c0_18 = arith.constant 0 : index
    %c0_19 = arith.constant 0 : index
    %45 = vector.load %arg5[%c0_18, %c0_19] : memref<32x8xf32, #tpu.memory_space<vmem>>, vector<32x8xf32>
    %cst_20 = arith.constant dense<0.000000e+00> : vector<64x8xf32>
    %46 = tpu.matmul %44, %45, %cst_20 {dimension_numbers = #tpu.dot_dimension_numbers<[1], [0], [0], [1], [0, 0, 1, 1], [], []>} : vector<64x32xf32>, vector<32x8xf32>, vector<64x8xf32> -> vector<64x8xf32>
    %c0_21 = arith.constant 0 : index
    %c0_22 = arith.constant 0 : index
    %47 = vector.load %arg6[%c0_21, %c0_22] : memref<1x8xf32, #tpu.memory_space<vmem>>, vector<1x8xf32>
    %48 = vector.broadcast %47 : vector<1x8xf32> to vector<64x8xf32>
    %49 = arith.addf %46, %48 : vector<64x8xf32>
    %50 = vector.shape_cast %49 : vector<64x8xf32> to vector<8x8x8xf32>
    %51 = vector.extract_strided_slice %50 {offsets = [0, 0, 0], sizes = [8, 2, 8], strides = [1, 1, 1]} : vector<8x8x8xf32> to vector<8x2x8xf32>
    %52 = tpu.transpose %51, [1, 0, 2] : vector<8x2x8xf32> -> vector<2x8x8xf32>
    %c0_23 = arith.constant 0 : index
    %c0_24 = arith.constant 0 : index
    %c0_25 = arith.constant 0 : index
    %53 = vector.load %arg7[%c0_23, %c0_24, %c0_25] : memref<2x8x8xf32, #tpu.memory_space<vmem>>, vector<2x8x8xf32>
    tpu.vector_store %arg7[%c0_23, %c0_24, %c0_25], %52 {strides = array<i32>} : memref<2x8x8xf32, #tpu.memory_space<vmem>>, vector<2x8x8xf32>,
    return
  }
  func.func @transform_0(%arg0: i32) -> (i32, i32, i32) {
    %c0_i32 = arith.constant 0 : i32
    %c0_i32_0 = arith.constant 0 : i32
    %c0_i32_1 = arith.constant 0 : i32
    %c0_i32_2 = arith.constant 0 : i32
    return %c0_i32, %c0_i32_0, %c0_i32_1 : i32, i32, i32
  }
  func.func @transform_1(%arg0: i32) -> (i32, i32) {
    %c0_i32 = arith.constant 0 : i32
    %c0_i32_0 = arith.constant 0 : i32
    %c0_i32_1 = arith.constant 0 : i32
    return %c0_i32, %c0_i32_0 : i32, i32
  }
  func.func @transform_2(%arg0: i32) -> (i32, i32) {
    %c0_i32 = arith.constant 0 : i32
    %c0_i32_0 = arith.constant 0 : i32
    %c0_i32_1 = arith.constant 0 : i32
    return %c0_i32, %c0_i32_0 : i32, i32
  }
  func.func @transform_3(%arg0: i32) -> (i32, i32) {
    %c0_i32 = arith.constant 0 : i32
    %c0_i32_0 = arith.constant 0 : i32
    %c0_i32_1 = arith.constant 0 : i32
    return %c0_i32, %c0_i32_0 : i32, i32
  }
  func.func @transform_4(%arg0: i32) -> (i32, i32) {
    %c0_i32 = arith.constant 0 : i32
    %c0_i32_0 = arith.constant 0 : i32
    %c0_i32_1 = arith.constant 0 : i32
    return %c0_i32, %c0_i32_0 : i32, i32
  }
  func.func @transform_5(%arg0: i32) -> (i32, i32) {
    %c0_i32 = arith.constant 0 : i32
    %c0_i32_0 = arith.constant 0 : i32
    %c0_i32_1 = arith.constant 0 : i32
    return %c0_i32, %c0_i32_0 : i32, i32
  }
  func.func @transform_6(%arg0: i32) -> (i32, i32, i32) {
    %c0_i32 = arith.constant 0 : i32
    %c0_i32_0 = arith.constant 0 : i32
    %c0_i32_1 = arith.constant 0 : i32
    %c0_i32_2 = arith.constant 0 : i32
    return %c0_i32, %c0_i32_0, %c0_i32_1 : i32, i32, i32
  }
}

</mosaic_0001>

<bundles_post_ra>
// kernel: custom_rnn_forward.1
= control target key start
LH: loop header
LB: loop body
LE: loop exit
PB: predicated region body
PF: predicated region fallthrough
CT: control target
= control target key end

     0   :  { %11 = vsyncpa [#allocation3], 0  ;;  %s1693_s0 = inlined_call_operand.hbm [shape: f32[2,8,16], index: 0, kind: input, shape index: {}]   ;;  %s1694_s1 = inlined_call_operand.hbm [shape: f32[16,32], index: 1, kind: input, shape index: {}]   ;;  %s1695_s2 = inlined_call_operand.vmem [shape: f32[32,32], index: 2, kind: input, shape index: {}]   ;;  %s1696_s3 = inlined_call_operand.vmem [shape: f32[1,32], index: 3, kind: input, shape index: {}]   ;;  %s1697_s4 = inlined_call_operand.vmem [shape: f32[32,8], index: 4, kind: input, shape index: {}]   ;;  %s1698_s5 = inlined_call_operand.vmem [shape: f32[1,8], index: 5, kind: input, shape index: {}]   ;;  %s1699_s6 = inlined_call_operand.hbm [shape: f32[2,8,8], index: 6, kind: output, shape index: {}]  }
   0x1   :  { %12 = vsyncpa [#allocation6], 0 }
   0x2   :  { %13 = vsyncpa [#allocation4], 0  ;;  %s1434_s21 = smov [#allocation2]   ;;  %s1362_s25 = scalar_lea.hbm %s1693_s0, 256 }
   0x3   :  { %s19_s22 = sshll.u32 %s1434_s21, 4  ;;  %p1363_p0 = scmp.ne.s32.totalorder %s1693_s0, %s1362_s25  ;;  %s20_s22 = int_to_ptr.vmem [resolvable:$true] %s19_s22 }
   0x4   :  { %p1366_p1 = scmp.lt.u32.totalorder %s1362_s25, %s1693_s0 }
   0x6   :  { %p1368_p2 = pnand %p1366_p1, %p1363_p0 }
   0x8   :  { %1371 = shalt.err (!%p1368_p2)
}
   0x9   :  { %s1372_s30 = scalar_lea.vmem %s20_s22, 256  ;;  %p1377_p4 = scmp.lt.s32.totalorder %s20_s22, %s20_s22 }
   0xa   :  { %p1373_p3 = scmp.ne.s32.totalorder %s20_s22, %s1372_s30  ;;  %p1378_p5 = scmp.lt.s32.totalorder %s1372_s30, %s1372_s30 }
   0xc   :  { %p1379_p6 = por %p1378_p5, %p1377_p4 }
   0xe   :  { %p1380_p7 = pnand %p1379_p6, %p1373_p3 }
  0x10   :  { %1383 = shalt.err (!%p1380_p7)
}
  0x11   :  { %s1435_s7 = smov 128   ;;  %s1436_s8 = smov 8  }
  0x12   :  { %25 = dma.hbm_to_vmem [thread:$0]  %s1693_s0, 256, %s20_s22, [#allocation3], %s1435_s7, %s1435_s7, %s1436_s8  }
  0x13   :  { %s1437_s11 = smov [#allocation5]   ;;  %s1384_s15 = scalar_lea.hbm %s1694_s1, 256 }
  0x14   :  { %s31_s12 = sshll.u32 %s1437_s11, 4  ;;  %p1385_p8 = scmp.ne.s32.totalorder %s1694_s1, %s1384_s15  ;;  %s32_s12 = int_to_ptr.vmem [resolvable:$true] %s31_s12 }
  0x15   :  { %p1388_p9 = scmp.lt.u32.totalorder %s1384_s15, %s1694_s1 }
  0x17   :  { %p1390_p10 = pnand %p1388_p9, %p1385_p8 }
  0x19   :  { %1393 = shalt.err (!%p1390_p10)
}
  0x1a   :  { %s1394_s20 = scalar_lea.vmem %s32_s12, 256  ;;  %p1399_p12 = scmp.lt.s32.totalorder %s32_s12, %s32_s12 }
  0x1b   :  { %p1395_p11 = scmp.ne.s32.totalorder %s32_s12, %s1394_s20  ;;  %p1400_p13 = scmp.lt.s32.totalorder %s1394_s20, %s1394_s20 }
  0x1d   :  { %p1401_p0 = por %p1400_p13, %p1399_p12 }
  0x1f   :  { %p1402_p1 = pnand %p1401_p0, %p1395_p11 }
  0x21   :  { %1405 = shalt.err (!%p1402_p1)
}
  0x22   :  { %37 = dma.hbm_to_vmem [thread:$0]  %s1694_s1, 256, %s32_s12, [#allocation6], %s1435_s7, %s1435_s7, %s1436_s8  }
  0x23   :  { %1428 = dma.done.wait [#allocation3], 256  }
  0x24   :  { %1429 = vsyncadd [#allocation3], 4294967040 }
  0x25   :  { %1430 = dma.done.wait [#allocation6], 256  }
  0x26   :  { %1431 = vsyncadd [#allocation6], 4294967040  ;;  %v58_v0 = vlaneseq  ;;  %v1438_v1 = vmov 1983009808   ;;  %v1439_v5 = vmov 1934713408  }
  0x27   :  { %v56_v2 = vunpack.c.l.s4 %v1438_v1  ;;  %v87_v6 = vunpack.c.l.s4 %v1439_v5  ;;  %v129_v8 = vld [vmem:[#allocation5] sm:$0xff]  ;;  %v130_v9 = vld [vmem:[#allocation5 + $0x8] sm:$0xff]  ;;  %v52_v10 = vld [vmem:[#allocation2] sm:$0xff]  ;;  %v1440_v14 = vmov 0.0   ;;  %v1441_v23 = vmov 0.0|0.0  }
  0x28   :  { %v59_v3 = vshrl.u32 %v58_v0, 7  ;;  %v1274_v12 = vpack.c.bf16 %v130_v9, %v129_v8  ;;  %v53_v13 = vld [vmem:[#allocation2 + $0x8] sm:$0xff]  ;;  %v54_v15 = vcombine.high %v52_v10, %v1440_v14  ;;  %vm120_vm0 = vcmask 1041408   ;;  %v268_v27 = vld [vmem:[%s1695_s2] sm:$0xff]  ;;  %v270_v39 = vld [vmem:[%s1695_s2 + $0x10] sm:$0xff] }
  0x29   :  { %v57_v4 = vunpack.c.0.s8 %v56_v2  ;;  %v88_v11 = vunpack.c.0.s8 %v87_v6  ;;  %v69_v17 = vcombine.high %v53_v13, %v1440_v14  ;;  %vm138_vm1 = vcmask 130048   ;;  %v269_v28 = vld [vmem:[%s1695_s2 + $0x8] sm:$0xff]  ;;  %v271_v40 = vld [vmem:[%s1695_s2 + $0x18] sm:$0xff]  ;;  %v1583_v48 = vld [vmem:[%s1696_s3] ss:$0 sm:$0xff] }
  0x2a   :  { %1334 = vmatprep.subr.bf16.mxu1 %v1274_v12  ;;  %1275 = vmatprep.subr.bf16.mxu0 %v1274_v12  ;;  %v1541_v35 = vpack.c.bf16 %v269_v28, %v268_v27  ;;  %v1561_v43 = vpack.c.bf16 %v271_v40, %v270_v39  ;;  %vm1442_vm2 = vmmov 0   ;;  %vm272_vm3 = vcmask 261120  }
  0x2b   :  { %v1509_v7 = vsub.s32 %v57_v4, %v59_v3  ;;  %1335 = vmatpush3.bf16.msra.mxu1 %v1274_v12  ;;  %v1521_v21 = vsub.s32 %v88_v11, %v59_v3  ;;  %1277 = vmatpush3.bf16.msra.mxu0 %v1274_v12  ;;  %vm1042_vm4 = vcmask 64512  }
  0x2c   :  { %1278 = vmatprep.subr.bf16.mxu1 %v1441_v23  ;;  %1290 = vmatprep.subr.bf16.mxu0 %v1441_v23 }
  0x2d   :  { %v1513_v16 = vrot.slane %v52_v10, %v1509_v7  ;;  %v1517_v18 = vrot.slane %v53_v13, %v1509_v7  ;;  %v68_v19 = vrot.slane %v54_v15, %v1509_v7  ;;  %v83_v20 = vrot.slane %v69_v17, %v1509_v7 }
  0x2f   :  { %v84_v22 = vcombine.low %v1513_v16, %v1517_v18  ;;  %v100_v24 = vcombine.low %v68_v19, %v83_v20  ;;  %v101_v26 = vcombine.high %v68_v19, %v83_v20  ;;  %v85_v56 = vcombine.high %v1513_v16, %v1517_v18 }
  0x31   :  { %v92_v25 = vrot.slane %v84_v22, %v1521_v21  ;;  %v108_v29 = vrot.slane %v100_v24, %v1521_v21  ;;  %v115_v32 = vrot.slane %v101_v26, %v1521_v21  ;;  %v99_v57 = vrot.slane %v85_v56, %v1521_v21  ;;  %v873_v22 = vld [vmem:[%s1697_s4] sm:$0xff]  ;;  %v874_v24 = vld [vmem:[%s1697_s4 + $0x8] sm:$0xff] }
  0x33   :  { %v116_v30 = vcombine.high %v92_v25, %v1440_v14  ;;  %v121_v31 = vsel %vm120_vm0, %v92_v25, 0.0  ;;  %v118_v33 = vcombine.high %v108_v29, %v1440_v14  ;;  %v125_v34 = vsel %vm120_vm0, %v108_v29, 0.0  ;;  %v876_v29 = vld [vmem:[%s1697_s4 + $0x18] sm:$0xff] }
  0x34   :  { %1154 = vmatprep.mubr.msk.f32.mxu0 %vm138_vm1, %v121_v31  ;;  %1160 = vmatprep.mubr.msk.f32.mxu1 %vm138_vm1, %v125_v34  ;;  %v127_v37 = vsel %vm120_vm0, %v115_v32, 0.0  ;;  %v119_v38 = vcombine.high %v115_v32, %v1440_v14  ;;  %v123_v58 = vsel %vm120_vm0, %v99_v57, 0.0  ;;  %v117_v59 = vcombine.high %v99_v57, %v1440_v14 }
  0x35   :  { %v122_v36 = vsel %vm120_vm0, %v116_v30, 0.0  ;;  %v126_v41 = vsel %vm120_vm0, %v118_v33, 0.0  ;;  %v1326_v25 = vpack.c.bf16 %v874_v24, %v873_v22 }
  0x36   :  { %1155 = vmatmul.mubr.msk.f32.vlgmr.msra.gmra.mrb[0].mxu0 %vm138_vm1, %v122_v36  ;;  %1161 = vmatmul.mubr.msk.f32.vlgmr.msra.gmra.mrb[0].mxu1 %vm138_vm1, %v126_v41  ;;  %v128_v42 = vsel %vm120_vm0, %v119_v38, 0.0  ;;  %v124_v60 = vsel %vm120_vm0, %v117_v59, 0.0  ;;  %v1079_v38 = vld [vmem:[%s1698_s5] ss:$0 sm:$0xff]  ;;  %s1443_s5 = smov [#allocation7]  }
  0x37   :  { %1292 = vmatpush3.bf16.msra.mxu0 %v1541_v35  ;;  %1280 = vmatpush3.bf16.msra.mxu1 %v1541_v35  ;;  %s1050_s16 = sshll.u32 %s1443_s5, 4  ;;  %s1051_s16 = int_to_ptr.vmem [resolvable:$true] %s1050_s16 }
  0x38   :  { %1293 = vmatprep.subr.bf16.mxu0 %v1441_v23  ;;  %1163 = vmatprep.mubr.msk.f32.mxu1 %vm138_vm1, %v127_v37  ;;  %s1406_s17 = scalar_lea.vmem %s1051_s16, 256  ;;  %p1411_p3 = scmp.lt.s32.totalorder %s1051_s16, %s1051_s16 }
  0x39   :  { %1281 = vmatprep.subr.bf16.mxu1 %v1441_v23  ;;  %1157 = vmatprep.mubr.msk.f32.mxu0 %vm138_vm1, %v123_v58  ;;  %p1407_p2 = scmp.ne.s32.totalorder %s1051_s16, %s1406_s17  ;;  %p1412_p4 = scmp.lt.s32.totalorder %s1406_s17, %s1406_s17 }
  0x3a   :  { %1164 = vmatmul.mubr.msk.f32.gmra.mrb[2].mxu1 %vm138_vm1, %v128_v42  ;;  %1158 = vmatmul.mubr.msk.f32.gmra.mrb[2].mxu0 %vm138_vm1, %v124_v60 }
  0x3b   :  { %1295 = vmatpush3.bf16.msra.mxu0 %v1561_v43  ;;  %1283 = vmatpush3.bf16.msra.mxu1 %v1561_v43  ;;  %p1413_p5 = por %p1412_p4, %p1411_p3 }
  0x3c   :  { %1302 = vmatprep.subr.bf16.mxu0 %v1441_v23  ;;  %1174 = vmatprep.mubr.msk.f32.mxu1 %vm1442_vm2, %v1440_v14 }
  0x3d   :  { %1284 = vmatprep.subr.bf16.mxu1 %v1441_v23  ;;  %1196 = vmatprep.mubr.msk.f32.mxu0 %vm1442_vm2, %v1440_v14  ;;  %p1414_p6 = pnand %p1413_p5, %p1407_p2 }
  0x3e   :  { %1175 = vmatmul.mubr.f32.vlgmr.msra.gmra.mrb[4].mxu1 %v1440_v14 }
  0x3f   :  { %1286 = vmatpush3.bf16.msra.mxu1 %v1541_v35  ;;  %1185 = vmatprep.mubr.msk.f32.mxu1 %vm1442_vm2, %v1440_v14 }
  0x40   :  { %1287 = vmatprep.subr.bf16.mxu1 %v1441_v23 }
  0x43   :  { %1289 = vmatpush3.bf16.msra.mxu1 %v1561_v43 }
  0x44   :  { %1296 = vmatprep.subr.bf16.mxu1 %v1441_v23 }
 0x109   :  { %v1156_v44 = vpop.f32.mrb[0].mxu0  ;;  %v1578_v46 = vpop.f32.mrb[0].mxu1 }
 0x10a   :  { %v229_v45 = vpop.f32.mrb[1].mxu0  ;;  %v249_v47 = vpop.f32.mrb[1].mxu1  ;;  %v235_v61 = vadd.f32 %v1156_v44, %v1583_v48  ;;  %v255_v26 = vadd.f32 %v1578_v46, %v1583_v48 }
 0x10b   :  { %v230_v50 = vadd.f32 %v1583_v48, %v229_v45  ;;  %v250_v16 = vadd.f32 %v1583_v48, %v249_v47 }
 0x10d   :  { %v1585_v49 = vpop.f32.mrb[2].mxu1  ;;  %v1159_v2 = vpop.f32.mrb[2].mxu0 }
 0x10e   :  { %v1588_v51 = vpop.f32.mrb[3].mxu1  ;;  %v239_v3 = vpop.f32.mrb[3].mxu0  ;;  %v245_v10 = vadd.f32 %v1159_v2, %v1583_v48 }
 0x10f   :  { %v240_v4 = vadd.f32 %v1583_v48, %v239_v3  ;;  %v260_v32 = vadd.f32 %v1583_v48, %v1588_v51 }
 0x111   :  { %v342_v52 = vpop.f32.mrb[4].mxu1 }
 0x112   :  { %v346_v53 = vadd.f32 %v342_v52, %v230_v50  ;;  %v1176_v54 = vpop.f32.mrb[5].mxu1 }
 0x114   :  { %1346 = vtanh.f32 %v346_v53 }
 0x11e   :  { %v1590_v55 = vpop.eup %1346 }
 0x11f   :  { %1186 = vmatmul.mubr.msk.f32.vlgmr.msra.gmra.mrb[6].mxu1 %vm272_vm3, %v1590_v55 }
 0x120   :  { %1298 = vmatpush3.bf16.msra.mxu1 %v1541_v35  ;;  %1207 = vmatprep.mubr.msk.f32.mxu1 %vm1442_vm2, %v1440_v14 }
 0x121   :  { %1299 = vmatprep.subr.bf16.mxu1 %v1441_v23 }
 0x124   :  { %1301 = vmatpush3.bf16.msra.mxu1 %v1561_v43 }
 0x125   :  { %1308 = vmatprep.subr.bf16.mxu1 %v1441_v23 }
 0x1f2   :  { %v417_v62 = vpop.f32.mrb[6].mxu1 }
 0x1f3   :  { %v421_v63 = vadd.f32 %v417_v62, %v235_v61  ;;  %v1187_v0 = vpop.f32.mrb[7].mxu1 }
 0x1f5   :  { %1348 = vtanh.f32 %v421_v63 }
 0x1ff   :  { %v1349_v1 = vpop.eup %1348 }
 0x200   :  { %1197 = vmatmul.mubr.msk.f32.vlgmr.msra.gmra.mrb[4].mxu0 %vm272_vm3, %v1349_v1 }
 0x201   :  { %1304 = vmatpush3.bf16.msra.mxu0 %v1541_v35  ;;  %1218 = vmatprep.mubr.msk.f32.mxu0 %vm1442_vm2, %v1440_v14 }
 0x202   :  { %1305 = vmatprep.subr.bf16.mxu0 %v1441_v23 }
 0x205   :  { %1307 = vmatpush3.bf16.msra.mxu0 %v1561_v43 }
 0x206   :  { %1314 = vmatprep.subr.bf16.mxu0 %v1441_v23 }
 0x2d3   :  { %v492_v5 = vpop.f32.mrb[4].mxu0 }
 0x2d4   :  { %v496_v6 = vadd.f32 %v492_v5, %v240_v4  ;;  %v1198_v8 = vpop.f32.mrb[5].mxu0 }
 0x2d6   :  { %1350 = vtanh.f32 %v496_v6 }
 0x2e0   :  { %v1351_v9 = vpop.eup %1350 }
 0x2e1   :  { %1208 = vmatmul.mubr.msk.f32.vlgmr.msra.gmra.mrb[8].mxu1 %vm272_vm3, %v1351_v9 }
 0x2e2   :  { %1310 = vmatpush3.bf16.msra.mxu1 %v1541_v35  ;;  %1229 = vmatprep.mubr.msk.f32.mxu1 %vm1442_vm2, %v1440_v14 }
 0x2e3   :  { %1311 = vmatprep.subr.bf16.mxu1 %v1441_v23 }
 0x2e6   :  { %1313 = vmatpush3.bf16.msra.mxu1 %v1561_v43 }
 0x2e7   :  { %1320 = vmatprep.subr.bf16.mxu1 %v1441_v23 }
 0x3b4   :  { %v567_v11 = vpop.f32.mrb[8].mxu1 }
 0x3b5   :  { %v571_v12 = vadd.f32 %v567_v11, %v245_v10  ;;  %v1209_v13 = vpop.f32.mrb[9].mxu1 }
 0x3b7   :  { %1352 = vtanh.f32 %v571_v12 }
 0x3c1   :  { %v1353_v15 = vpop.eup %1352 }
 0x3c2   :  { %1219 = vmatmul.mubr.msk.f32.vlgmr.msra.gmra.mrb[6].mxu0 %vm272_vm3, %v1353_v15 }
 0x3c3   :  { %1316 = vmatpush3.bf16.msra.mxu0 %v1541_v35  ;;  %1240 = vmatprep.mubr.msk.f32.mxu0 %vm1442_vm2, %v1440_v14 }
 0x3c4   :  { %1317 = vmatprep.subr.bf16.mxu0 %v1441_v23 }
 0x3c7   :  { %1319 = vmatpush3.bf16.msra.mxu0 %v1561_v43 }
 0x3c8   :  { %1327 = vmatprep.subr.bf16.mxu0 %v1326_v25 }
 0x495   :  { %v642_v17 = vpop.f32.mrb[6].mxu0 }
 0x496   :  { %v646_v18 = vadd.f32 %v642_v17, %v250_v16  ;;  %v1220_v19 = vpop.f32.mrb[7].mxu0 }
 0x498   :  { %1354 = vtanh.f32 %v646_v18 }
 0x4a2   :  { %v1355_v20 = vpop.eup %1354 }
 0x4a3   :  { %1230 = vmatmul.mubr.msk.f32.vlgmr.msra.gmra.mrb[10].mxu1 %vm272_vm3, %v1355_v20 }
 0x4a4   :  { %1322 = vmatpush3.bf16.msra.mxu1 %v1541_v35  ;;  %1251 = vmatprep.mubr.msk.f32.mxu1 %vm1442_vm2, %v1440_v14 }
 0x4a5   :  { %1323 = vmatprep.subr.bf16.mxu1 %v1441_v23  ;;  %v875_v23 = vld [vmem:[%s1697_s4 + $0x10] sm:$0xff] }
 0x4a6   :  { %v1330_v30 = vpack.c.bf16 %v876_v29, %v875_v23 }
 0x4a8   :  { %1325 = vmatpush3.bf16.msra.mxu1 %v1561_v43 }
 0x576   :  { %v717_v27 = vpop.f32.mrb[10].mxu1 }
 0x577   :  { %v721_v28 = vadd.f32 %v717_v27, %v255_v26  ;;  %v1231_v14 = vpop.f32.mrb[11].mxu1 }
 0x579   :  { %1356 = vtanh.f32 %v721_v28 }
 0x583   :  { %v1357_v31 = vpop.eup %1356 }
 0x584   :  { %1241 = vmatmul.mubr.msk.f32.vlgmr.msra.gmra.mrb[8].mxu0 %vm272_vm3, %v1357_v31 }
 0x585   :  { %1329 = vmatpush3.bf16.msra.mxu0 %v1326_v25  ;;  %1262 = vmatprep.mubr.msk.f32.mxu0 %vm272_vm3, %v1590_v55  ;;  %v265_v55 = vadd.f32 %v1585_v49, %v1583_v48 }
 0x586   :  { %1331 = vmatprep.subr.bf16.mxu0 %v1330_v30 }
 0x589   :  { %1333 = vmatpush3.bf16.msra.mxu0 %v1330_v30 }
 0x58c   :  { %1263 = vmatmul.mubr.msk.f32.vlgmr.msra.gmra.mrb[10].mxu0 %vm272_vm3, %v1349_v1 }
 0x58d   :  { %1265 = vmatprep.mubr.msk.f32.mxu0 %vm272_vm3, %v1351_v9 }
 0x590   :  { %1266 = vmatmul.mubr.msk.f32.gmra.mrb[12].mxu0 %vm272_vm3, %v1353_v15 }
 0x591   :  { %1268 = vmatprep.mubr.msk.f32.mxu0 %vm272_vm3, %v1355_v20 }
 0x594   :  { %1269 = vmatmul.mubr.msk.f32.gmra.mrb[14].mxu0 %vm272_vm3, %v1357_v31 }
 0x657   :  { %v792_v33 = vpop.f32.mrb[8].mxu0 }
 0x658   :  { %v796_v34 = vadd.f32 %v792_v33, %v260_v32  ;;  %v1242_v35 = vpop.f32.mrb[9].mxu0 }
 0x65a   :  { %1358 = vtanh.f32 %v796_v34 }
 0x65f   :  { %v1264_v36 = vpop.f32.mrb[10].mxu0 }
 0x660   :  { %v953_v37 = vpop.f32.mrb[11].mxu0  ;;  %v959_v41 = vadd.f32 %v1264_v36, %v1079_v38 }
 0x661   :  { %v954_v44 = vadd.f32 %v1079_v38, %v953_v37 }
 0x663   :  { %v1267_v39 = vpop.f32.mrb[12].mxu0 }
 0x664   :  { %v1359_v40 = vpop.eup %1358  ;;  %v969_v42 = vadd.f32 %v1267_v39, %v1079_v38  ;;  %v963_v43 = vpop.f32.mrb[13].mxu0 }
 0x665   :  { %v964_v45 = vadd.f32 %v1079_v38, %v963_v43  ;;  %1252 = vmatmul.mubr.msk.f32.vlgmr.msra.gmra.mrb[12].mxu1 %vm272_vm3, %v1359_v40  ;;  %1271 = vmatprep.mubr.msk.f32.mxu0 %vm272_vm3, %v1359_v40 }
 0x666   :  { %v1000_v46 = vcombine.low %v959_v41, %v969_v42 }
 0x667   :  { %v992_v47 = vcombine.low %v954_v44, %v964_v45  ;;  %v1270_v50 = vpop.f32.mrb[14].mxu0 }
 0x668   :  { %v1007_v51 = vrot.slane %v1000_v46, %v1509_v7  ;;  %v973_v52 = vpop.f32.mrb[15].mxu0  ;;  %v979_v61 = vadd.f32 %v1270_v50, %v1079_v38 }
 0x669   :  { %v999_v53 = vrot.slane %v992_v47, %v1509_v7  ;;  %v974_v0 = vadd.f32 %v1079_v38, %v973_v52 }
 0x66b   :  { %v1024_v54 = vcombine.low %v999_v53, %v1007_v51 }
 0x66d   :  { %v1031_v49 = vrot.slane %v1024_v54, %v1521_v21 }
 0x738   :  { %v867_v56 = vpop.f32.mrb[12].mxu1 }
 0x739   :  { %v871_v57 = vadd.f32 %v867_v56, %v265_v55  ;;  %v1253_v58 = vpop.f32.mrb[13].mxu1 }
 0x73b   :  { %1360 = vtanh.f32 %v871_v57 }
 0x745   :  { %v1361_v59 = vpop.eup %1360 }
 0x746   :  { %1272 = vmatmul.mubr.msk.f32.gmra.mrb[16].mxu0 %vm272_vm3, %v1361_v59 }
 0x819   :  { %v1273_v60 = vpop.f32.mrb[16].mxu0 }
 0x81a   :  { %v989_v62 = vadd.f32 %v1273_v60, %v1079_v38  ;;  %v983_v63 = vpop.f32.mrb[17].mxu0 }
 0x81b   :  { %v984_v1 = vadd.f32 %v1079_v38, %v983_v63 }
 0x81c   :  { %v1016_v2 = vcombine.low %v979_v61, %v989_v62 }
 0x81d   :  { %v1008_v3 = vcombine.low %v974_v0, %v984_v1 }
 0x81e   :  { %v1023_v4 = vrot.slane %v1016_v2, %v1509_v7 }
 0x81f   :  { %v1015_v5 = vrot.slane %v1008_v3, %v1509_v7 }
 0x821   :  { %v1032_v48 = vcombine.low %v1015_v5, %v1023_v4 }
 0x823   :  { %v1039_v6 = vrot.slane %v1032_v48, %v1521_v21 }
 0x825   :  { %v1040_v8 = vcombine.low %v1031_v49, %v1039_v6  ;;  %v1041_v9 = vcombine.high %v1031_v49, %v1039_v6 }
 0x827   :  { %1043 = vst.msk [vmem:[#allocation7] sm:$0xff] %vm1042_vm4, %v1040_v8  ;;  %1044 = vst.msk [vmem:[#allocation7 + $0x8] sm:$0xff] %vm1042_vm4, %v1041_v9 }
 0x828   :  { %1417 = shalt.err (!%p1414_p6)
}
 0x829   :  { %s1418_s20 = scalar_lea.hbm %s1699_s6, 256 }
 0x82a   :  { %p1419_p7 = scmp.ne.s32.totalorder %s1699_s6, %s1418_s20  ;;  %p1422_p8 = scmp.lt.u32.totalorder %s1418_s20, %s1699_s6 }
 0x82c   :  { %p1424_p9 = pnand %p1422_p8, %p1419_p7 }
 0x82e   :  { %1427 = shalt.err (!%p1424_p9)
}
 0x82f   :  { %1056 = dma.vmem_to_hbm [thread:$0]  %s1051_s16, 256, %s1699_s6, [#allocation4], %s1435_s7, %s1435_s7, %s1436_s8  }
 0x830   :  { %1432 = dma.done.wait [#allocation4], 256  }
 0x831   :  { %1433 = vsyncadd [#allocation4], 4294967040 }
 0x832   :  { %1060 = vsyncpa [#allocation3], 1 }
 0x833   :  { %1061 = vsyncpa [#allocation6], 1 }
 0x834   :  { %1062 = vsyncpa [#allocation4], 1 }

</bundles_post_ra>
